<compile_context>
chip_gen: v5e
topology: v5e:2x2
jax: 0.10.0
libtpu: 0.0.40
codegen_flags: <defaults>
</compile_context>

<pallas_src>
import functools

import jax
import jax.numpy as jnp
from jax import lax
from jax.experimental import pallas as pl
from jax.experimental.pallas import tpu as pltpu


# ----------------------------------------------------------------------------
# Kernel
# ----------------------------------------------------------------------------
def _mlp_kernel(activation, n_hidden,
                x_ref, w_in_ref, b_in_ref, w_hid_ref, b_hid_ref,
                w_out_ref, b_out_ref, out_ref):
    """Fused MLP forward for one batch tile.

    x_ref     : [TILE_B, IN_P]      bf16
    w_in_ref  : [IN_P,  H_P]        bf16   (input-major, pre-transposed)
    b_in_ref  : [1, H_P]            f32
    w_hid_ref : [L, H_P, H_P]       bf16   (stacked hidden layers, L = depth-1)
    b_hid_ref : [L, 1, H_P]         f32
    w_out_ref : [H_P, OUT_P]        bf16
    b_out_ref : [1, OUT_P]          f32
    out_ref   : [TILE_B, OUT_P]     f32
    """

    def act(a):
        return jnp.tanh(a) if activation == "tanh" else jnp.maximum(a, 0.0)

    # Layer 0: bf16 x bf16 -> f32 accumulate on the MXU; bias/activation in f32.
    h32 = jnp.dot(x_ref[...], w_in_ref[...],
                  preferred_element_type=jnp.float32) + b_in_ref[...]
    h = act(h32).astype(jnp.bfloat16)

    # Hidden H -> H layers (stacked), each followed by the activation.
    if n_hidden > 0:
        def body(i, h_carry):
            a = jnp.dot(h_carry, w_hid_ref[i],
                        preferred_element_type=jnp.float32) + b_hid_ref[i]
            return act(a).astype(jnp.bfloat16)

        h = lax.fori_loop(0, n_hidden, body, h, unroll=True)

    # Final Linear: no activation (matches the PyTorch module).
    out = jnp.dot(h, w_out_ref[...],
                  preferred_element_type=jnp.float32) + b_out_ref[...]
    out_ref[...] = out.astype(out_ref.dtype)


# ----------------------------------------------------------------------------
# Wrapper
# ----------------------------------------------------------------------------
def _round_up(v, m):
    return (v + m - 1) // m * m


def mlp_forward(x, weights, biases, activation="tanh", tile_b=None):
    """Run the fused MLP Pallas kernel.

    x:       [batch, input_dim]
    weights: PyTorch-convention weights, W_i of shape [out_i, in_i]
    biases:  biases, b_i of shape [out_i]
    """
    n_layers = len(weights)          # depth hidden Linears + 1 output Linear
    depth = n_layers - 1             # number of Linear+activation blocks
    batch, in_dim = x.shape
    hidden_dim = weights[0].shape[0]
    out_dim = weights[-1].shape[0]
    n_hidden = depth - 1             # number of stacked H->H layers

    # ---- hardware-granule padding -------------------------------------------
    in_p = _round_up(max(in_dim, 1), 128)
    h_p = _round_up(max(hidden_dim, 1), 128)
    out_p = _round_up(max(out_dim, 1), 128)

    if tile_b is None:
        # Big tiles amortize the ~0.35 us/step grid overhead; cap at 256 rows.
        tile_b = min(_round_up(batch, 8), 256)
    b_p = _round_up(batch, tile_b)
    grid = (pl.cdiv(b_p, tile_b),)

    # ---- parameter preparation (glue, not hot path) --------------------------
    def prep_w(w, ip, op_):
        w = jnp.asarray(w, jnp.float32).T                      # [in, out]
        w = jnp.pad(w, ((0, ip - w.shape[0]), (0, op_ - w.shape[1])))
        return w.astype(jnp.bfloat16)                          # MXU operand dtype

    def prep_b(b, op_):
        b = jnp.asarray(b, jnp.float32).reshape(1, -1)
        return jnp.pad(b, ((0, 0), (0, op_ - b.shape[1])))      # stays f32

    w_in = prep_w(weights[0], in_p, h_p)
    b_in = prep_b(biases[0], h_p)

    if n_hidden > 0:
        w_hid = jnp.stack([prep_w(w, h_p, h_p) for w in weights[1:depth]])
        b_hid = jnp.stack([prep_b(b, h_p) for b in biases[1:depth]])
    else:  # dummy (skipped in-kernel via static n_hidden)
        w_hid = jnp.zeros((1, h_p, h_p), jnp.bfloat16)
        b_hid = jnp.zeros((1, 1, h_p), jnp.float32)

    w_out = prep_w(weights[depth], h_p, out_p)
    b_out = prep_b(biases[depth], out_p)

    x_p = jnp.pad(jnp.asarray(x, jnp.float32),
                  ((0, b_p - batch), (0, in_p - in_dim))).astype(jnp.bfloat16)

    # ---- specs ----------------------------------------------------------------
    in_specs = [
        pl.BlockSpec((tile_b, in_p), lambda i: (i, 0)),            # x: batch-tiled
        pl.BlockSpec((in_p, h_p), lambda i: (0, 0)),               # w_in: resident
        pl.BlockSpec((1, h_p), lambda i: (0, 0)),                  # b_in
        pl.BlockSpec(w_hid.shape, lambda i: (0, 0, 0)),            # stacked hidden W
        pl.BlockSpec(b_hid.shape, lambda i: (0, 0, 0)),            # stacked hidden b
        pl.BlockSpec((h_p, out_p), lambda i: (0, 0)),              # w_out
        pl.BlockSpec((1, out_p), lambda i: (0, 0)),                # b_out
    ]
    out_spec = pl.BlockSpec((tile_b, out_p), lambda i: (i, 0))

    # ---- cost / VMEM hints ----------------------------------------------------
    flops = 2 * batch * (in_dim * hidden_dim
                         + n_hidden * hidden_dim * hidden_dim
                         + hidden_dim * out_dim)
    transcendentals = batch * hidden_dim * depth if activation == "tanh" else 0
    param_bytes = (w_in.size + w_hid.size + w_out.size) * 2 \
        + (b_in.size + b_hid.size + b_out.size) * 4
    io_bytes = x_p.size * 2 + b_p * out_p * 4
    cost = pl.CostEstimate(flops=int(flops),
                           transcendentals=int(transcendentals),
                           bytes_accessed=int(param_bytes + io_bytes))

    est_vmem = 2 * param_bytes + 4 * tile_b * (in_p * 2 + out_p * 4 + h_p * 4)
    vmem_limit = int(min(max(2 * est_vmem, 32 * 2**20), 64 * 2**20))

    kernel = functools.partial(_mlp_kernel, activation, n_hidden)

    out_full = pl.pallas_call(
        kernel,
        out_shape=jax.ShapeDtypeStruct((b_p, out_p), jnp.float32),
        grid=grid,
        in_specs=in_specs,
        out_specs=out_spec,
        compiler_params=pltpu.CompilerParams(
            dimension_semantics=("parallel",),
            vmem_limit_bytes=vmem_limit,
        ),
        cost_estimate=cost,
    )(x_p, w_in, b_in, w_hid, b_hid, w_out, b_out)

    return out_full[:batch, :out_dim]


# ----------------------------------------------------------------------------
# Deterministic parameter init (mirrors the PyTorch __init__, shape-wise)
# ----------------------------------------------------------------------------
def init_params(key, input_dim, output_dim, hidden_dim, depth, activation):
    weights, biases = [], []
    dims = [(input_dim, hidden_dim)]
    for _ in range(depth - 1):
        dims.append((hidden_dim, hidden_dim))
    dims.append((hidden_dim, output_dim))

    for (fan_in, fan_out) in dims:
        key, kw, kb = jax.random.split(key, 3)
        if activation == "tanh":
            bound = jnp.sqrt(6.0 / (fan_in + fan_out))           # xavier_uniform_
        else:
            bound = jnp.sqrt(2.0) * jnp.sqrt(3.0 / fan_in)       # kaiming_uniform_
        w = jax.random.uniform(kw, (fan_out, fan_in), jnp.float32, -bound, bound)
        b_bound = 1.0 / jnp.sqrt(fan_in)                          # default Linear bias
        b = jax.random.uniform(kb, (fan_out,), jnp.float32, -b_bound, b_bound)
        weights.append(w)
        biases.append(b)
    return weights, biases


# ----------------------------------------------------------------------------
# Pure-JAX references
# ----------------------------------------------------------------------------
def mlp_reference_mxu(x, weights, biases, activation="tanh"):
    """Emulates the kernel's dtype path: bf16 operands, f32 accumulation."""
    h = jnp.asarray(x, jnp.float32).astype(jnp.bfloat16)
    n = len(weights)
    for i, (w, b) in enumerate(zip(weights, biases)):
        wt = jnp.asarray(w, jnp.float32).T.astype(jnp.bfloat16)
        a = jnp.dot(h, wt, preferred_element_type=jnp.float32) \
            + jnp.asarray(b, jnp.float32)
        if i < n - 1:
            a = jnp.tanh(a) if activation == "tanh" else jnp.maximum(a, 0.0)
            h = a.astype(jnp.bfloat16)
        else:
            h = a
    return h


def mlp_reference_f32(x, weights, biases, activation="tanh"):
    h = jnp.asarray(x, jnp.float32)
    n = len(weights)
    for i, (w, b) in enumerate(zip(weights, biases)):
        h = h @ jnp.asarray(w, jnp.float32).T + jnp.asarray(b, jnp.float32)
        if i < n - 1:
            h = jnp.tanh(h) if activation == "tanh" else jnp.maximum(h, 0.0)
    return h


if __name__ == "__main__":
    # Bank-note dataset has 4 features; pick small synthetic dims.
    batch = 8
    input_dim = 4
    output_dim = 2
    hidden_dim = 32
    depth = 3
    activation = "tanh"

    key = jax.random.PRNGKey(0)
    key, kx = jax.random.split(key)
    x = jax.random.normal(kx, (batch, input_dim), jnp.float32)

    weights, biases = init_params(key, input_dim, output_dim, hidden_dim,
                                  depth, activation)

    out = mlp_forward(x, weights, biases, activation)
    out = jax.block_until_ready(out)
    assert out.shape == (batch, output_dim)

    # Exact-path check (bf16 operands, f32 accumulation — same math as kernel).
    ref_mxu = mlp_reference_mxu(x, weights, biases, activation)
    assert jnp.allclose(out, ref_mxu, atol=1e-3, rtol=1e-3), \
        "mismatch vs bf16/f32-accumulate reference"

    # Sanity check against the full-f32 reference (bf16 rounding tolerance).
    ref_f32 = mlp_reference_f32(x, weights, biases, activation)
    assert jnp.allclose(out, ref_f32, atol=1e-1, rtol=1e-1), \
        "mismatch vs f32 reference beyond bf16 tolerance"

    print("KERNEL_OK")
</pallas_src>

<mosaic_0001>
module attributes {stable_mosaic.version = 11 : i64} {
  func.func @_mlp_kernel(%arg0: i32, %arg1: memref<8x128xbf16, #tpu.memory_space<vmem>>, %arg2: memref<128x128xbf16, #tpu.memory_space<vmem>>, %arg3: memref<1x128xf32, #tpu.memory_space<vmem>>, %arg4: memref<2x128x128xbf16, #tpu.memory_space<vmem>>, %arg5: memref<2x1x128xf32, #tpu.memory_space<vmem>>, %arg6: memref<128x128xbf16, #tpu.memory_space<vmem>>, %arg7: memref<1x128xf32, #tpu.memory_space<vmem>>, %arg8: memref<8x128xf32, #tpu.memory_space<vmem>>) attributes {dimension_semantics = [#tpu.dimension_semantics<parallel>], iteration_bounds = array<i64: 1>, scalar_prefetch = 0 : i64, scratch_operands = 0 : i64, tpu.core_type = #tpu.core_type<tc>, window_params = [{transform_indices = @transform_0, window_bounds = array<i64: 8, 128>}, {pipeline_mode = #tpu.pipeline_mode<synchronous>, transform_indices = @transform_1, window_bounds = array<i64: 128, 128>}, {pipeline_mode = #tpu.pipeline_mode<synchronous>, transform_indices = @transform_2, window_bounds = array<i64: 1, 128>}, {pipeline_mode = #tpu.pipeline_mode<synchronous>, transform_indices = @transform_3, window_bounds = array<i64: 2, 128, 128>}, {pipeline_mode = #tpu.pipeline_mode<synchronous>, transform_indices = @transform_4, window_bounds = array<i64: 2, 1, 128>}, {pipeline_mode = #tpu.pipeline_mode<synchronous>, transform_indices = @transform_5, window_bounds = array<i64: 128, 128>}, {pipeline_mode = #tpu.pipeline_mode<synchronous>, transform_indices = @transform_6, window_bounds = array<i64: 1, 128>}, {transform_indices = @transform_7, window_bounds = array<i64: 8, 128>}]} {
    %c0 = arith.constant 0 : index
    %c0_0 = arith.constant 0 : index
    %0 = vector.load %arg1[%c0, %c0_0] : memref<8x128xbf16, #tpu.memory_space<vmem>>, vector<8x128xbf16>
    %c0_1 = arith.constant 0 : index
    %c0_2 = arith.constant 0 : index
    %1 = vector.load %arg2[%c0_1, %c0_2] : memref<128x128xbf16, #tpu.memory_space<vmem>>, vector<128x128xbf16>
    %cst = arith.constant dense<0.000000e+00> : vector<8x128xf32>
    %2 = tpu.matmul %0, %1, %cst {dimension_numbers = #tpu.dot_dimension_numbers<[1], [0], [0], [1], [0, 0, 1, 1], [], []>} : vector<8x128xbf16>, vector<128x128xbf16>, vector<8x128xf32> -> vector<8x128xf32>
    %c0_3 = arith.constant 0 : index
    %c0_4 = arith.constant 0 : index
    %3 = vector.load %arg3[%c0_3, %c0_4] : memref<1x128xf32, #tpu.memory_space<vmem>>, vector<1x128xf32>
    %4 = vector.broadcast %3 : vector<1x128xf32> to vector<8x128xf32>
    %5 = arith.addf %2, %4 : vector<8x128xf32>
    %6 = math.tanh %5 : vector<8x128xf32>
    %7 = arith.truncf %6 : vector<8x128xf32> to vector<8x128xbf16>
    %c0_i32 = arith.constant 0 : i32
    %8 = arith.index_cast %c0_i32 : i32 to index
    %c0_5 = arith.constant 0 : index
    %c0_6 = arith.constant 0 : index
    %9 = vector.load %arg4[%8, %c0_5, %c0_6] : memref<2x128x128xbf16, #tpu.memory_space<vmem>>, vector<1x128x128xbf16>
    %10 = vector.shape_cast %9 : vector<1x128x128xbf16> to vector<128x128xbf16>
    %cst_7 = arith.constant dense<0.000000e+00> : vector<8x128xf32>
    %11 = tpu.matmul %7, %10, %cst_7 {dimension_numbers = #tpu.dot_dimension_numbers<[1], [0], [0], [1], [0, 0, 1, 1], [], []>} : vector<8x128xbf16>, vector<128x128xbf16>, vector<8x128xf32> -> vector<8x128xf32>
    %12 = arith.index_cast %c0_i32 : i32 to index
    %c0_8 = arith.constant 0 : index
    %c0_9 = arith.constant 0 : index
    %13 = vector.load %arg5[%12, %c0_8, %c0_9] : memref<2x1x128xf32, #tpu.memory_space<vmem>>, vector<1x1x128xf32>
    %14 = vector.shape_cast %13 : vector<1x1x128xf32> to vector<1x128xf32>
    %15 = vector.broadcast %14 : vector<1x128xf32> to vector<8x128xf32>
    %16 = arith.addf %11, %15 : vector<8x128xf32>
    %17 = math.tanh %16 : vector<8x128xf32>
    %18 = arith.truncf %17 : vector<8x128xf32> to vector<8x128xbf16>
    %c1_i32 = arith.constant 1 : i32
    %19 = arith.index_cast %c1_i32 : i32 to index
    %c0_10 = arith.constant 0 : index
    %c0_11 = arith.constant 0 : index
    %20 = vector.load %arg4[%19, %c0_10, %c0_11] : memref<2x128x128xbf16, #tpu.memory_space<vmem>>, vector<1x128x128xbf16>
    %21 = vector.shape_cast %20 : vector<1x128x128xbf16> to vector<128x128xbf16>
    %cst_12 = arith.constant dense<0.000000e+00> : vector<8x128xf32>
    %22 = tpu.matmul %18, %21, %cst_12 {dimension_numbers = #tpu.dot_dimension_numbers<[1], [0], [0], [1], [0, 0, 1, 1], [], []>} : vector<8x128xbf16>, vector<128x128xbf16>, vector<8x128xf32> -> vector<8x128xf32>
    %23 = arith.index_cast %c1_i32 : i32 to index
    %c0_13 = arith.constant 0 : index
    %c0_14 = arith.constant 0 : index
    %24 = vector.load %arg5[%23, %c0_13, %c0_14] : memref<2x1x128xf32, #tpu.memory_space<vmem>>, vector<1x1x128xf32>
    %25 = vector.shape_cast %24 : vector<1x1x128xf32> to vector<1x128xf32>
    %26 = vector.broadcast %25 : vector<1x128xf32> to vector<8x128xf32>
    %27 = arith.addf %22, %26 : vector<8x128xf32>
    %28 = math.tanh %27 : vector<8x128xf32>
    %29 = arith.truncf %28 : vector<8x128xf32> to vector<8x128xbf16>
    %c2_i32 = arith.constant 2 : i32
    %c0_15 = arith.constant 0 : index
    %c0_16 = arith.constant 0 : index
    %30 = vector.load %arg6[%c0_15, %c0_16] : memref<128x128xbf16, #tpu.memory_space<vmem>>, vector<128x128xbf16>
    %cst_17 = arith.constant dense<0.000000e+00> : vector<8x128xf32>
    %31 = tpu.matmul %29, %30, %cst_17 {dimension_numbers = #tpu.dot_dimension_numbers<[1], [0], [0], [1], [0, 0, 1, 1], [], []>} : vector<8x128xbf16>, vector<128x128xbf16>, vector<8x128xf32> -> vector<8x128xf32>
    %c0_18 = arith.constant 0 : index
    %c0_19 = arith.constant 0 : index
    %32 = vector.load %arg7[%c0_18, %c0_19] : memref<1x128xf32, #tpu.memory_space<vmem>>, vector<1x128xf32>
    %33 = vector.broadcast %32 : vector<1x128xf32> to vector<8x128xf32>
    %34 = arith.addf %31, %33 : vector<8x128xf32>
    %c0_20 = arith.constant 0 : index
    %c0_21 = arith.constant 0 : index
    %35 = vector.load %arg8[%c0_20, %c0_21] : memref<8x128xf32, #tpu.memory_space<vmem>>, vector<8x128xf32>
    tpu.vector_store %arg8[%c0_20, %c0_21], %34 {strides = array<i32>} : memref<8x128xf32, #tpu.memory_space<vmem>>, vector<8x128xf32>,
    return
  }
  func.func @transform_0(%arg0: i32) -> (i32, i32) {
    %c0_i32 = arith.constant 0 : i32
    %c0_i32_0 = arith.constant 0 : i32
    return %arg0, %c0_i32 : i32, i32
  }
  func.func @transform_1(%arg0: i32) -> (i32, i32) {
    %c0_i32 = arith.constant 0 : i32
    %c0_i32_0 = arith.constant 0 : i32
    %c0_i32_1 = arith.constant 0 : i32
    return %c0_i32, %c0_i32_0 : i32, i32
  }
  func.func @transform_2(%arg0: i32) -> (i32, i32) {
    %c0_i32 = arith.constant 0 : i32
    %c0_i32_0 = arith.constant 0 : i32
    %c0_i32_1 = arith.constant 0 : i32
    return %c0_i32, %c0_i32_0 : i32, i32
  }
  func.func @transform_3(%arg0: i32) -> (i32, i32, i32) {
    %c0_i32 = arith.constant 0 : i32
    %c0_i32_0 = arith.constant 0 : i32
    %c0_i32_1 = arith.constant 0 : i32
    %c0_i32_2 = arith.constant 0 : i32
    return %c0_i32, %c0_i32_0, %c0_i32_1 : i32, i32, i32
  }
  func.func @transform_4(%arg0: i32) -> (i32, i32, i32) {
    %c0_i32 = arith.constant 0 : i32
    %c0_i32_0 = arith.constant 0 : i32
    %c0_i32_1 = arith.constant 0 : i32
    %c0_i32_2 = arith.constant 0 : i32
    return %c0_i32, %c0_i32_0, %c0_i32_1 : i32, i32, i32
  }
  func.func @transform_5(%arg0: i32) -> (i32, i32) {
    %c0_i32 = arith.constant 0 : i32
    %c0_i32_0 = arith.constant 0 : i32
    %c0_i32_1 = arith.constant 0 : i32
    return %c0_i32, %c0_i32_0 : i32, i32
  }
  func.func @transform_6(%arg0: i32) -> (i32, i32) {
    %c0_i32 = arith.constant 0 : i32
    %c0_i32_0 = arith.constant 0 : i32
    %c0_i32_1 = arith.constant 0 : i32
    return %c0_i32, %c0_i32_0 : i32, i32
  }
  func.func @transform_7(%arg0: i32) -> (i32, i32) {
    %c0_i32 = arith.constant 0 : i32
    %c0_i32_0 = arith.constant 0 : i32
    return %arg0, %c0_i32 : i32, i32
  }
}

</mosaic_0001>

<bundles_post_ra>
// kernel: tpu_custom_call.1
= control target key start
LH: loop header
LB: loop body
LE: loop exit
PB: predicated region body
PF: predicated region fallthrough
CT: control target
= control target key end

     0   :  { %12 = vsyncpa [#allocation3], 0  ;;  %s821_s0 = inlined_call_operand.hbm [shape: bf16[8,128], index: 0, kind: input, shape index: {}]   ;;  %s822_s1 = inlined_call_operand.hbm [shape: bf16[128,128], index: 1, kind: input, shape index: {}]   ;;  %s823_s2 = inlined_call_operand.vmem [shape: f32[1,128], index: 2, kind: input, shape index: {}]   ;;  %s824_s3 = inlined_call_operand.hbm [shape: bf16[2,128,128], index: 3, kind: input, shape index: {}]   ;;  %s825_s4 = inlined_call_operand.vmem [shape: f32[2,1,128], index: 4, kind: input, shape index: {}]   ;;  %s826_s5 = inlined_call_operand.hbm [shape: bf16[128,128], index: 5, kind: input, shape index: {}]   ;;  %s827_s6 = inlined_call_operand.vmem [shape: f32[1,128], index: 6, kind: input, shape index: {}]   ;;  %s828_s7 = inlined_call_operand.hbm [shape: f32[8,128], index: 7, kind: output, shape index: {}]  }
   0x1   :  { %13 = vsyncpa [#allocation6], 0 }
   0x2   :  { %14 = vsyncpa [#allocation9], 0  ;;  %s31_s26 = sshll.u32 %s822_s1, 4  ;;  %s32_s26 = int_to_ptr.hbm [resolvable:$true] %s31_s26 }
   0x3   :  { %15 = vsyncpa [#allocation4], 0  ;;  %s747_s27 = smov [#allocation5]   ;;  %s21_s8 = sshll.u32 %s821_s0, 4  ;;  %s22_s8 = int_to_ptr.hbm [resolvable:$true] %s21_s8 }
   0x4   :  { %s33_s28 = sshll.u32 %s747_s27, 4  ;;  %s748_s9 = smov 64   ;;  %s34_s28 = int_to_ptr.vmem [resolvable:$true] %s33_s28 }
   0x5   :  { %s749_s10 = smov 4   ;;  %s750_s11 = smov [#allocation2]  }
   0x6   :  { %39 = dma.hbm_to_vmem [thread:$0]  %s32_s26, 1024, %s34_s28, [#allocation6], %s748_s9, %s748_s9, %s749_s10  }
   0x7   :  { %s23_s12 = sshll.u32 %s750_s11, 4  ;;  %s46_s15 = sshll.u32 %s824_s3, 4  ;;  %s24_s12 = int_to_ptr.vmem [resolvable:$true] %s23_s12  ;;  %s47_s15 = int_to_ptr.hbm [resolvable:$true] %s46_s15 }
   0x8   :  { %26 = dma.hbm_to_vmem [thread:$0]  %s22_s8, 64, %s24_s12, [#allocation3]  }
   0x9   :  { %s61_s17 = sshll.u32 %s826_s5, 4  ;;  %s751_s18 = smov [#allocation7]   ;;  %s62_s17 = int_to_ptr.hbm [resolvable:$true] %s61_s17 }
   0xa   :  { %s48_s19 = sshll.u32 %s751_s18, 4  ;;  %s752_s0 = smov [#allocation8]   ;;  %s49_s19 = int_to_ptr.vmem [resolvable:$true] %s48_s19 }
   0xb   :  { %54 = dma.hbm_to_vmem [thread:$0]  %s47_s15, 2048, %s49_s19, [#allocation6], %s748_s9, %s748_s9, %s749_s10  }
   0xc   :  { %s63_s20 = sshll.u32 %s752_s0, 4  ;;  %s64_s20 = int_to_ptr.vmem [resolvable:$true] %s63_s20 }
   0xd   :  { %69 = dma.hbm_to_vmem [thread:$0]  %s62_s17, 1024, %s64_s20, [#allocation9], %s748_s9, %s748_s9, %s749_s10  }
   0xe   :  { %739 = dma.done.wait [#allocation3], 64  }
   0xf   :  { %740 = vsyncadd [#allocation3], 4294967232 }
  0x10   :  { %741 = dma.done.wait [#allocation6], 3072  }
  0x11   :  { %742 = vsyncadd [#allocation6], 4294964224 }
  0x12   :  { %743 = dma.done.wait [#allocation9], 1024  }
  0x13   :  { %744 = vsyncadd [#allocation9], 4294966272  ;;  %v577_v0 = vld [vmem:[#allocation5 + $0x38] sm:$0xff]  ;;  %v576_v1 = vld [vmem:[#allocation5 + $0x30] sm:$0xff]  ;;  %s753_s26 = smov [#allocation10]   ;;  %s429_s30 = sshll.u32 %s828_s7, 4  ;;  %s430_s30 = int_to_ptr.hbm [resolvable:$true] %s429_s30 }
  0x14   :  { %157 = vmatpush.bf16.msra.mxu0 %v577_v0  ;;  %v585_v2 = vld [vmem:[#allocation7 + $0x38] sm:$0xff]  ;;  %v584_v3 = vld [vmem:[#allocation7 + $0x30] sm:$0xff]  ;;  %v575_v4 = vld [vmem:[#allocation5 + $0x28] sm:$0xff]  ;;  %s427_s27 = sshll.u32 %s753_s26, 4  ;;  %s428_s27 = int_to_ptr.vmem [resolvable:$true] %s427_s27 }
  0x15   :  { %240 = vmatpush.bf16.msra.mxu1 %v585_v2  ;;  %v583_v5 = vld [vmem:[#allocation7 + $0x28] sm:$0xff]  ;;  %v574_v6 = vld [vmem:[#allocation5 + $0x20] sm:$0xff]  ;;  %v573_v8 = vld [vmem:[#allocation5 + $0x18] sm:$0xff] }
  0x16   :  { %v582_v7 = vld [vmem:[#allocation7 + $0x20] sm:$0xff]  ;;  %v581_v9 = vld [vmem:[#allocation7 + $0x18] sm:$0xff]  ;;  %v572_v10 = vld [vmem:[#allocation5 + $0x10] sm:$0xff] }
  0x17   :  { %v571_v11 = vld [vmem:[#allocation5 + $0x8] sm:$0xff]  ;;  %v570_v12 = vld [vmem:[#allocation5] sm:$0xff]  ;;  %v88_v13 = vld [vmem:[#allocation2] sm:$0xf] }
  0x18   :  { %158 = vmatpush.bf16.msra.mxu0 %v576_v1  ;;  %v580_v14 = vld [vmem:[#allocation7 + $0x10] sm:$0xff]  ;;  %v579_v15 = vld [vmem:[#allocation7 + $0x8] sm:$0xff]  ;;  %v578_v16 = vld [vmem:[#allocation7] sm:$0xff] }
  0x19   :  { %241 = vmatpush.bf16.msra.mxu1 %v584_v3  ;;  %v593_v17 = vld [vmem:[#allocation7 + $0x78] sm:$0xff]  ;;  %v592_v18 = vld [vmem:[#allocation7 + $0x70] sm:$0xff]  ;;  %v591_v19 = vld [vmem:[#allocation7 + $0x68] sm:$0xff] }
  0x1a   :  { %325 = vmatpush.bf16.msra.mxu2 %v593_v17  ;;  %v590_v20 = vld [vmem:[#allocation7 + $0x60] sm:$0xff]  ;;  %v589_v21 = vld [vmem:[#allocation7 + $0x58] sm:$0xff]  ;;  %v588_v28 = vld [vmem:[#allocation7 + $0x50] sm:$0xff] }
  0x1b   :  { %v609_v22 = vld [vmem:[%s823_s2] ss:$0 sm:$0xff]  ;;  %v587_v29 = vld [vmem:[#allocation7 + $0x48] sm:$0xff]  ;;  %v586_v30 = vld [vmem:[#allocation7 + $0x40] sm:$0xff] }
  0x1c   :  { %159 = vmatpush.bf16.msra.mxu0 %v575_v4  ;;  %v601_v31 = vld [vmem:[#allocation8 + $0x38] sm:$0xff]  ;;  %v600_v32 = vld [vmem:[#allocation8 + $0x30] sm:$0xff]  ;;  %v599_v33 = vld [vmem:[#allocation8 + $0x28] sm:$0xff] }
  0x1d   :  { %242 = vmatpush.bf16.msra.mxu1 %v583_v5  ;;  %408 = vmatpush.bf16.msra.mxu3 %v601_v31  ;;  %v598_v34 = vld [vmem:[#allocation8 + $0x20] sm:$0xff]  ;;  %v597_v35 = vld [vmem:[#allocation8 + $0x18] sm:$0xff]  ;;  %v596_v42 = vld [vmem:[#allocation8 + $0x10] sm:$0xff] }
  0x1e   :  { %326 = vmatpush.bf16.msra.mxu2 %v592_v18  ;;  %v610_v36 = vld [vmem:[%s825_s4] ss:$0 sm:$0xff]  ;;  %v595_v43 = vld [vmem:[#allocation8 + $0x8] sm:$0xff]  ;;  %v594_v44 = vld [vmem:[#allocation8] sm:$0xff] }
  0x1f   :  { %v611_v45 = vld [vmem:[%s825_s4 + $0x1] ss:$0 sm:$0xff]  ;;  %v612_v51 = vld [vmem:[%s827_s6] ss:$0 sm:$0xff] }
  0x20   :  { %160 = vmatpush.bf16.msra.mxu0 %v574_v6 }
  0x21   :  { %243 = vmatpush.bf16.msra.mxu1 %v582_v7  ;;  %409 = vmatpush.bf16.msra.mxu3 %v600_v32 }
  0x22   :  { %327 = vmatpush.bf16.msra.mxu2 %v591_v19 }
  0x24   :  { %161 = vmatpush.bf16.msra.mxu0 %v573_v8 }
  0x25   :  { %244 = vmatpush.bf16.msra.mxu1 %v581_v9  ;;  %410 = vmatpush.bf16.msra.mxu3 %v599_v33 }
  0x26   :  { %328 = vmatpush.bf16.msra.mxu2 %v590_v20 }
  0x28   :  { %162 = vmatpush.bf16.msra.mxu0 %v572_v10 }
  0x29   :  { %245 = vmatpush.bf16.msra.mxu1 %v580_v14  ;;  %411 = vmatpush.bf16.msra.mxu3 %v598_v34 }
  0x2a   :  { %329 = vmatpush.bf16.msra.mxu2 %v589_v21 }
  0x2c   :  { %163 = vmatpush.bf16.msra.mxu0 %v571_v11 }
  0x2d   :  { %246 = vmatpush.bf16.msra.mxu1 %v579_v15  ;;  %412 = vmatpush.bf16.msra.mxu3 %v597_v35 }
  0x2e   :  { %330 = vmatpush.bf16.msra.mxu2 %v588_v28 }
  0x30   :  { %164 = vmatpush.bf16.msra.mxu0 %v570_v12 }
  0x31   :  { %247 = vmatpush.bf16.msra.mxu1 %v578_v16  ;;  %413 = vmatpush.bf16.msra.mxu3 %v596_v42 }
  0x32   :  { %331 = vmatpush.bf16.msra.mxu2 %v587_v29 }
  0x33   :  { %165 = vmatmul.bf16.vlgmr.msra.gmra.mxu0 %v88_v13 }
  0x35   :  { %414 = vmatpush.bf16.msra.mxu3 %v595_v43 }
  0x36   :  { %332 = vmatpush.bf16.msra.mxu2 %v586_v30 }
  0x39   :  { %415 = vmatpush.bf16.msra.mxu3 %v594_v44 }
  0xb0   :  { %v166_v23 = vpop.f32.mrf.mxu0 }
  0xb1   :  { %v167_v24 = vadd.f32 %v609_v22, %v166_v23 }
  0xb3   :  { %613 = vtanh.f32 %v167_v24 }
  0xb8   :  { %v168_v25 = vpop.f32.mrf.mxu0 }
  0xb9   :  { %v614_v26 = vpop.eup %613 }
  0xba   :  { %v171_v27 = vpack.c.bf16 %v614_v26, %v614_v26 }
  0xbc   :  { %248 = vmatmul.bf16.vlgmr.msra.gmra.mxu1 %v171_v27 }
 0x139   :  { %v249_v37 = vpop.f32.mrf.mxu1 }
 0x13a   :  { %v250_v38 = vadd.f32 %v610_v36, %v249_v37 }
 0x13c   :  { %615 = vtanh.f32 %v250_v38 }
 0x141   :  { %v251_v39 = vpop.f32.mrf.mxu1 }
 0x142   :  { %v616_v40 = vpop.eup %615 }
 0x143   :  { %v254_v41 = vpack.c.bf16 %v616_v40, %v616_v40 }
 0x145   :  { %333 = vmatmul.bf16.vlgmr.msra.gmra.mxu2 %v254_v41 }
 0x1c8   :  { %v334_v46 = vpop.f32.mrf.mxu2 }
 0x1c9   :  { %v335_v47 = vadd.f32 %v611_v45, %v334_v46 }
 0x1cb   :  { %617 = vtanh.f32 %v335_v47 }
 0x1d0   :  { %v336_v48 = vpop.f32.mrf.mxu2 }
 0x1d1   :  { %v618_v49 = vpop.eup %617 }
 0x1d2   :  { %v339_v50 = vpack.c.bf16 %v618_v49, %v618_v49 }
 0x1d4   :  { %416 = vmatmul.bf16.vlgmr.msra.gmra.mxu3 %v339_v50 }
 0x257   :  { %v417_v52 = vpop.f32.mrf.mxu3 }
 0x258   :  { %v418_v53 = vadd.f32 %v612_v51, %v417_v52 }
 0x25a   :  { %421 = vst [vmem:[#allocation10] sm:$0xff] %v418_v53 }
 0x25b   :  { %432 = dma.vmem_to_hbm [thread:$0]  %s428_s27, 128, %s430_s30, [#allocation4]  }
 0x25f   :  { %v419_v54 = vpop.f32.mrf.mxu3 }
 0x260   :  { %745 = dma.done.wait [#allocation4], 128  }
 0x261   :  { %746 = vsyncadd [#allocation4], 4294967168 }
 0x262   :  { %437 = vsyncpa [#allocation3], 1 }
 0x263   :  { %438 = vsyncpa [#allocation6], 1 }
 0x264   :  { %439 = vsyncpa [#allocation9], 1 }
 0x265   :  { %440 = vsyncpa [#allocation4], 1 }

</bundles_post_ra>
